<compile_context>
chip_gen: v5e
topology: v5e:2x2
jax: 0.10.0
libtpu: 0.0.40
codegen_flags: <defaults>
</compile_context>

<pallas_src>
import jax
import jax.numpy as jnp
from jax.experimental import pallas as pl
from jax.experimental.pallas import tpu as pltpu

# ---------------- model dimensions (consistent with the module) ----------------
OBS_DIM, COND_DIM, LATENT_DIM, HIDDEN_DIM = 16, 8, 4, 32
H1 = HIDDEN_DIM          # 32
H2 = HIDDEN_DIM // 2     # 16
EPS = 1e-8
LANES = 128

# ----- fused-weight slab row offsets (all multiples of 8 -> sublane-aligned slices) -----
_OFF_W1  = 0                                  # (24, 64): [obs rows|cond rows] x [prior h1|recog h1]
_OFF_W2  = _OFF_W1 + OBS_DIM + COND_DIM       # (64, 32): block-diag pW2 (+) rW2
_OFF_W3  = _OFF_W2 + 2 * H1                   # (32, 16): block-diag [pW31|pW32] (+) [rW31|rW32]
_OFF_GW1 = _OFF_W3 + 2 * H2                   # ( 8, 16): gen fc1 (rows 4:8 zero -> K padded to 8)
_OFF_GW2 = _OFF_GW1 + 8                       # (16, 32)
_OFF_GW3 = _OFF_GW2 + H2                      # (32, 16)
_W_ROWS  = _OFF_GW3 + H1                      # 176

# bias rows: 0=[pb1|rb1] 1=[pb2|rb2] 2=[pb31|pb32|rb31|rb32] 3=gb1 4=gb2 5=gb3
_B_ROWS = 8

# output-slab lane layout
_O_PMEAN  = 0
_O_PSCALE = _O_PMEAN + LATENT_DIM
_O_QMEAN  = _O_PSCALE + LATENT_DIM
_O_QSCALE = _O_QMEAN + LATENT_DIM
_O_OBSHAT = _O_QSCALE + LATENT_DIM
_LOSS_COL = _O_OBSHAT + OBS_DIM               # [0,_LOSS_COL]=mse, [0,_LOSS_COL+1]=kld

# Exact reciprocal keeps fp32 parity with the PyTorch-semantics reference (1e-4).
# approx=True uses the EUP vrcp slot but with reduced precision (see header).
_APPROX_SILU = False


def _silu(x):
    if _APPROX_SILU:
        return x * pl.reciprocal(1.0 + jnp.exp(-x), approx=True)
    return x / (1.0 + jnp.exp(-x))


def _softplus(x):
    # numerically stable softplus (matches torch.nn.functional.softplus)
    return jnp.maximum(x, 0.0) + jnp.log1p(jnp.exp(-jnp.abs(x)))


def cvae_kernel(obs_ref, cond_ref, noise_ref, w_ref, b_ref, out_ref):
    f32 = jnp.float32
    obs = obs_ref[...]          # (B, 16)
    cond = cond_ref[...]        # (B, 8)
    noise = noise_ref[...]      # (B, 4)
    B = obs.shape[0]

    def mm(a, row_off, k, n):
        return jnp.dot(a, w_ref[row_off:row_off + k, 0:n], preferred_element_type=f32)

    def bias(row, n):
        return b_ref[row:row + 1, 0:n]

    # ---- both encoders as ONE block-diagonal network: 3 MXU pushes ----
    oc = jnp.concatenate([obs, cond], axis=1)                                   # (B, 24)
    h1 = _silu(mm(oc, _OFF_W1, OBS_DIM + COND_DIM, 2 * H1) + bias(0, 2 * H1))   # [h_p|h_r] (B,64)
    h2 = _silu(mm(h1, _OFF_W2, 2 * H1, 2 * H2) + bias(1, 2 * H2))               # [h_p|h_r] (B,32)
    ph = mm(h2, _OFF_W3, 2 * H2, 4 * LATENT_DIM) + bias(2, 4 * LATENT_DIM)      # (B,16)
    # ph = [pmean | plogvar | qmean | qlogvar]

    # scale = exp(logvar + eps) (eps added BEFORE exp, as in src/cvae.py); one EUP push.
    exps = jnp.exp(ph + EPS)
    lane = jax.lax.broadcasted_iota(jnp.int32, ph.shape, 1)
    stats = jnp.where(lane % (2 * LATENT_DIM) >= LATENT_DIM, exps, ph)
    # stats = [pmean | pscale | qmean | qscale]  -- already in output-lane order

    pmean   = ph[:, 0:LATENT_DIM]
    plogvar = ph[:, LATENT_DIM:2 * LATENT_DIM]
    qmean   = ph[:, 2 * LATENT_DIM:3 * LATENT_DIM]
    qlogvar = ph[:, 3 * LATENT_DIM:4 * LATENT_DIM]
    pscale  = exps[:, LATENT_DIM:2 * LATENT_DIM]
    qscale  = exps[:, 3 * LATENT_DIM:4 * LATENT_DIM]

    # ---- latents = prior.rsample() (reparameterization with supplied noise) ----
    z = pmean + pscale * noise
    # pad contraction to K=8 (gW1 slab rows 4:8 are zero, so the pad lanes are inert)
    z8 = jnp.concatenate([z, jnp.zeros_like(z)], axis=1)

    # ---- obs_hat = generation_net(latents): 3 MXU pushes ----
    g = _silu(mm(z8, _OFF_GW1, 2 * LATENT_DIM, H2) + bias(3, H2))
    g = _silu(mm(g, _OFF_GW2, H2, H1) + bias(4, H1))
    obs_hat = _softplus(mm(g, _OFF_GW3, H1, OBS_DIM) + bias(5, OBS_DIM))

    # ---- losses from ONE combined element buffer (single sublane reduce) ----
    diff = obs_hat - obs
    inv_q = 1.0 / qscale
    sr = pscale * inv_q                        # pscale / qscale  (no exp(log_var_ratio))
    t1 = (pmean - qmean) * inv_q
    kl_elem = 0.5 * (sr * sr + t1 * t1 - 1.0 - 2.0 * (plogvar - qlogvar))
    loss_elems = jnp.concatenate([diff * diff * (1.0 / (B * OBS_DIM)), kl_elem], axis=1)
    colsum = jnp.sum(loss_elems, axis=0, keepdims=True)                         # (1, 20)
    mse = jnp.sum(colsum[:, 0:OBS_DIM], axis=1, keepdims=True)                  # (1, 1)
    kld = jnp.sum(colsum[:, OBS_DIM:OBS_DIM + LATENT_DIM], axis=1, keepdims=True)

    # ---- assemble the lane-dense output slab in registers; single full-width store ----
    tail_shape = (B, LANES - _O_OBSHAT - OBS_DIM)                               # (B, 96)
    lane_t = jax.lax.broadcasted_iota(jnp.int32, tail_shape, 1)
    row_t = jax.lax.broadcasted_iota(jnp.int32, tail_shape, 0)
    tail = jnp.where((row_t == 0) & (lane_t == 0), mse,
                     jnp.where((row_t == 0) & (lane_t == 1), kld, 0.0))
    out_ref[...] = jnp.concatenate([stats, obs_hat, tail], axis=1)              # (B, 128)


@jax.jit
def cvae_forward(obs, cond, noise, w_slab, b_slab):
    """obs (B,16), cond (B,8), noise (B,4) + one-time packed (w_slab, b_slab)."""
    B = obs.shape[0]
    vmem = pl.BlockSpec(memory_space=pltpu.MemorySpace.VMEM)
    out = pl.pallas_call(
        cvae_kernel,
        out_shape=jax.ShapeDtypeStruct((B, LANES), jnp.float32),
        in_specs=[vmem, vmem, vmem, vmem, vmem],
        out_specs=vmem,
    )(obs, cond, noise, w_slab, b_slab)

    pmean   = out[:, _O_PMEAN:_O_PMEAN + LATENT_DIM]
    pscale  = out[:, _O_PSCALE:_O_PSCALE + LATENT_DIM]
    qmean   = out[:, _O_QMEAN:_O_QMEAN + LATENT_DIM]
    qscale  = out[:, _O_QSCALE:_O_QSCALE + LATENT_DIM]
    obs_hat = out[:, _O_OBSHAT:_O_OBSHAT + OBS_DIM]
    mse = out[0, _LOSS_COL]
    kld = out[0, _LOSS_COL + 1]
    return pmean, pscale, qmean, qscale, obs_hat, mse, kld


def init_params(key):
    """Deterministic synthetic weights, stored [in, out] (transposed vs nn.Linear)."""
    def lin(k, fan_in, fan_out):
        kw, kb = jax.random.split(k)
        W = jax.random.normal(kw, (fan_in, fan_out), jnp.float32) * 0.1
        b = jax.random.normal(kb, (1, fan_out), jnp.float32) * 0.01
        return W, b

    ks = jax.random.split(key, 10)
    # prior_net: Encoder(condition_dim, latent_dim, H1, H2)
    pW1, pb1 = lin(ks[0], COND_DIM, H1)
    pW2, pb2 = lin(ks[1], H1, H2)
    pW31, pb31 = lin(ks[2], H2, LATENT_DIM)
    pW32, pb32 = lin(ks[3], H2, LATENT_DIM)
    # recognition_net: Encoder(obs_dim + condition_dim, latent_dim, H1, H2)
    rW1, rb1 = lin(ks[4], OBS_DIM + COND_DIM, H1)
    rW1o, rW1c = rW1[:OBS_DIM], rW1[OBS_DIM:]
    rW2, rb2 = lin(ks[5], H1, H2)
    rW31, rb31 = lin(ks[6], H2, LATENT_DIM)
    rW32, rb32 = lin(ks[7], H2, LATENT_DIM)
    # generation_net: Decoder(latent_dim, obs_dim, H2, H1)
    gW1, gb1 = lin(ks[8], LATENT_DIM, H2)
    gW2, gb2 = lin(ks[9], H2, H1)
    gW3, gb3 = lin(jax.random.fold_in(key, 99), H1, OBS_DIM)

    return (pW1, pb1, pW2, pb2, pW31, pb31, pW32, pb32,
            rW1o, rW1c, rb1, rW2, rb2, rW31, rb31, rW32, rb32,
            gW1, gb1, gW2, gb2, gW3, gb3)


def pack_params(params):
    """Host-side ONE-TIME packing of all weights/biases into two lane-dense slabs.

    The prior and recognition encoders are laid out block-diagonally so that the
    kernel runs both branches with a single matmul per layer.
    """
    (pW1, pb1, pW2, pb2, pW31, pb31, pW32, pb32,
     rW1o, rW1c, rb1, rW2, rb2, rW31, rb31, rW32, rb32,
     gW1, gb1, gW2, gb2, gW3, gb3) = params

    def put(slab, r0, c0, mat):
        k, n = mat.shape
        return slab.at[r0:r0 + k, c0:c0 + n].set(mat)

    w = jnp.zeros((_W_ROWS, LANES), jnp.float32)
    # fused fc1: LHS = [obs | cond]; output lanes = [prior h1 (0:32) | recog h1 (32:64)]
    w = put(w, _OFF_W1,           H1, rW1o)    # obs rows  -> recognition columns
    w = put(w, _OFF_W1 + OBS_DIM, 0,  pW1)     # cond rows -> prior columns
    w = put(w, _OFF_W1 + OBS_DIM, H1, rW1c)    # cond rows -> recognition columns
    # fc2: block-diagonal
    w = put(w, _OFF_W2,      0,  pW2)
    w = put(w, _OFF_W2 + H1, H2, rW2)
    # fc3: block-diagonal, per-branch heads fused [fc31 | fc32]
    w = put(w, _OFF_W3,      0,              jnp.concatenate([pW31, pW32], axis=1))
    w = put(w, _OFF_W3 + H2, 2 * LATENT_DIM, jnp.concatenate([rW31, rW32], axis=1))
    # generation net (gW1 rows 4:8 stay zero -> K padded to a full sublane tile)
    w = put(w, _OFF_GW1, 0, gW1)
    w = put(w, _OFF_GW2, 0, gW2)
    w = put(w, _OFF_GW3, 0, gW3)

    def putb(slab, row, col, vec):
        v = vec.reshape(-1)
        return slab.at[row, col:col + v.shape[0]].set(v)

    b = jnp.zeros((_B_ROWS, LANES), jnp.float32)
    b = putb(b, 0, 0,  pb1)
    b = putb(b, 0, H1, rb1)
    b = putb(b, 1, 0,  pb2)
    b = putb(b, 1, H2, rb2)
    b = putb(b, 2, 0,  jnp.concatenate([pb31, pb32], axis=1))
    b = putb(b, 2, 2 * LATENT_DIM, jnp.concatenate([rb31, rb32], axis=1))
    b = putb(b, 3, 0, gb1)
    b = putb(b, 4, 0, gb2)
    b = putb(b, 5, 0, gb3)
    return w, b


def cvae_reference(obs, cond, noise, params):
    """Pure-JAX reference mirroring the PyTorch forward (for validation)."""
    (pW1, pb1, pW2, pb2, pW31, pb31, pW32, pb32,
     rW1o, rW1c, rb1, rW2, rb2, rW31, rb31, rW32, rb32,
     gW1, gb1, gW2, gb2, gW3, gb3) = params
    silu = lambda x: x * (1.0 / (1.0 + jnp.exp(-x)))
    # prior
    h = silu(cond @ pW1 + pb1)
    h = silu(h @ pW2 + pb2)
    pmean = h @ pW31 + pb31
    pscale = jnp.exp(h @ pW32 + pb32 + EPS)
    z = pmean + pscale * noise
    # decoder
    g = silu(z @ gW1 + gb1)
    g = silu(g @ gW2 + gb2)
    obs_hat = jax.nn.softplus(g @ gW3 + gb3)
    # posterior (concat input)
    x = jnp.concatenate([obs, cond], axis=1)
    rW1 = jnp.concatenate([rW1o, rW1c], axis=0)
    r = silu(x @ rW1 + rb1)
    r = silu(r @ rW2 + rb2)
    qmean = r @ rW31 + rb31
    qscale = jnp.exp(r @ rW32 + rb32 + EPS)
    mse = jnp.mean((obs_hat - obs) ** 2)
    var_ratio = (pscale / qscale) ** 2
    t1 = ((pmean - qmean) / qscale) ** 2
    kld = jnp.sum(0.5 * (var_ratio + t1 - 1.0 - jnp.log(var_ratio)))
    return pmean, pscale, qmean, qscale, obs_hat, mse, kld


if __name__ == "__main__":
    B = 8
    key = jax.random.PRNGKey(0)
    k_obs, k_cond, k_noise, k_par = jax.random.split(key, 4)
    obs = jax.random.uniform(k_obs, (B, OBS_DIM), jnp.float32)
    cond = jax.random.normal(k_cond, (B, COND_DIM), jnp.float32)
    noise = jax.random.normal(k_noise, (B, LATENT_DIM), jnp.float32)  # rsample noise

    params = init_params(k_par)
    w_slab, b_slab = pack_params(params)

    outs = jax.block_until_ready(cvae_forward(obs, cond, noise, w_slab, b_slab))

    # sanity check against pure-JAX reference (fp32 parity)
    refs = cvae_reference(obs, cond, noise, params)
    names = ["prior_mean", "prior_scale", "post_mean", "post_scale", "obs_hat", "mse", "kld"]
    for name, o, r in zip(names, outs, refs):
        o = jnp.asarray(o).reshape(-1)
        r = jnp.asarray(r).reshape(-1)
        assert jnp.allclose(o, r, atol=1e-4, rtol=1e-4), f"mismatch in {name}"

    print("KERNEL_OK")
</pallas_src>

<mosaic_0001>
module attributes {stable_mosaic.version = 11 : i64} {
  func.func @cvae_kernel(%arg0: memref<8x16xf32, #tpu.memory_space<vmem>>, %arg1: memref<8x8xf32, #tpu.memory_space<vmem>>, %arg2: memref<8x4xf32, #tpu.memory_space<vmem>>, %arg3: memref<176x128xf32, #tpu.memory_space<vmem>>, %arg4: memref<8x128xf32, #tpu.memory_space<vmem>>, %arg5: memref<8x128xf32, #tpu.memory_space<vmem>>) attributes {dimension_semantics = [], scalar_prefetch = 0 : i64, scratch_operands = 0 : i64, tpu.core_type = #tpu.core_type<tc>} {
    %c0 = arith.constant 0 : index
    %c0_0 = arith.constant 0 : index
    %0 = vector.load %arg0[%c0, %c0_0] : memref<8x16xf32, #tpu.memory_space<vmem>>, vector<8x16xf32>
    %c0_1 = arith.constant 0 : index
    %c0_2 = arith.constant 0 : index
    %1 = vector.load %arg1[%c0_1, %c0_2] : memref<8x8xf32, #tpu.memory_space<vmem>>, vector<8x8xf32>
    %c0_3 = arith.constant 0 : index
    %c0_4 = arith.constant 0 : index
    %2 = vector.load %arg2[%c0_3, %c0_4] : memref<8x4xf32, #tpu.memory_space<vmem>>, vector<8x4xf32>
    %3 = tpu.concatenate %0, %1 in 1 : vector<8x16xf32>, vector<8x8xf32> -> vector<8x24xf32>
    %c0_5 = arith.constant 0 : index
    %c0_6 = arith.constant 0 : index
    %4 = vector.load %arg3[%c0_5, %c0_6] : memref<176x128xf32, #tpu.memory_space<vmem>>, vector<24x64xf32>
    %cst = arith.constant dense<0.000000e+00> : vector<8x64xf32>
    %5 = tpu.matmul %3, %4, %cst {dimension_numbers = #tpu.dot_dimension_numbers<[1], [0], [0], [1], [0, 0, 1, 1], [], []>} : vector<8x24xf32>, vector<24x64xf32>, vector<8x64xf32> -> vector<8x64xf32>
    %c0_7 = arith.constant 0 : index
    %c0_8 = arith.constant 0 : index
    %6 = vector.load %arg4[%c0_7, %c0_8] : memref<8x128xf32, #tpu.memory_space<vmem>>, vector<1x64xf32>
    %7 = vector.broadcast %6 : vector<1x64xf32> to vector<8x64xf32>
    %8 = arith.addf %5, %7 : vector<8x64xf32>
    %cst_9 = arith.constant 0.000000e+00 : f32
    %9 = vector.broadcast %cst_9 : f32 to vector<8x64xf32>
    %10 = arith.subf %9, %8 : vector<8x64xf32>
    %11 = math.exp %10 : vector<8x64xf32>
    %cst_10 = arith.constant 1.000000e+00 : f32
    %12 = vector.broadcast %cst_10 : f32 to vector<8x64xf32>
    %13 = arith.addf %12, %11 : vector<8x64xf32>
    %14 = arith.divf %8, %13 : vector<8x64xf32>
    %c24 = arith.constant 24 : index
    %c0_11 = arith.constant 0 : index
    %15 = vector.load %arg3[%c24, %c0_11] : memref<176x128xf32, #tpu.memory_space<vmem>>, vector<64x32xf32>
    %cst_12 = arith.constant dense<0.000000e+00> : vector<8x32xf32>
    %16 = tpu.matmul %14, %15, %cst_12 {dimension_numbers = #tpu.dot_dimension_numbers<[1], [0], [0], [1], [0, 0, 1, 1], [], []>} : vector<8x64xf32>, vector<64x32xf32>, vector<8x32xf32> -> vector<8x32xf32>
    %c1 = arith.constant 1 : index
    %c0_13 = arith.constant 0 : index
    %17 = vector.load %arg4[%c1, %c0_13] : memref<8x128xf32, #tpu.memory_space<vmem>>, vector<1x32xf32>
    %18 = vector.broadcast %17 : vector<1x32xf32> to vector<8x32xf32>
    %19 = arith.addf %16, %18 : vector<8x32xf32>
    %cst_14 = arith.constant 0.000000e+00 : f32
    %20 = vector.broadcast %cst_14 : f32 to vector<8x32xf32>
    %21 = arith.subf %20, %19 : vector<8x32xf32>
    %22 = math.exp %21 : vector<8x32xf32>
    %cst_15 = arith.constant 1.000000e+00 : f32
    %23 = vector.broadcast %cst_15 : f32 to vector<8x32xf32>
    %24 = arith.addf %23, %22 : vector<8x32xf32>
    %25 = arith.divf %19, %24 : vector<8x32xf32>
    %c88 = arith.constant 88 : index
    %c0_16 = arith.constant 0 : index
    %26 = vector.load %arg3[%c88, %c0_16] : memref<176x128xf32, #tpu.memory_space<vmem>>, vector<32x16xf32>
    %cst_17 = arith.constant dense<0.000000e+00> : vector<8x16xf32>
    %27 = tpu.matmul %25, %26, %cst_17 {dimension_numbers = #tpu.dot_dimension_numbers<[1], [0], [0], [1], [0, 0, 1, 1], [], []>} : vector<8x32xf32>, vector<32x16xf32>, vector<8x16xf32> -> vector<8x16xf32>
    %c2 = arith.constant 2 : index
    %c0_18 = arith.constant 0 : index
    %28 = vector.load %arg4[%c2, %c0_18] : memref<8x128xf32, #tpu.memory_space<vmem>>, vector<1x16xf32>
    %29 = vector.broadcast %28 : vector<1x16xf32> to vector<8x16xf32>
    %30 = arith.addf %27, %29 : vector<8x16xf32>
    %cst_19 = arith.constant 9.99999993E-9 : f32
    %31 = vector.broadcast %cst_19 : f32 to vector<8x16xf32>
    %32 = arith.addf %30, %31 : vector<8x16xf32>
    %33 = math.exp %32 : vector<8x16xf32>
    %34 = tpu.iota {dimensions = array<i32: 1>} : vector<8x16xi32>
    %c8_i32 = arith.constant 8 : i32
    %c0_i32 = arith.constant 0 : i32
    %35 = arith.cmpi eq, %c8_i32, %c0_i32 : i32
    %c1_i32 = arith.constant 1 : i32
    %36 = arith.select %35, %c1_i32, %c8_i32 : i32
    %37 = vector.broadcast %36 : i32 to vector<8x16xi32>
    %38 = arith.remsi %34, %37 : vector<8x16xi32>
    %c0_i32_20 = arith.constant 0 : i32
    %39 = vector.broadcast %c0_i32_20 : i32 to vector<8x16xi32>
    %40 = arith.cmpi ne, %38, %39 : vector<8x16xi32>
    %c0_i32_21 = arith.constant 0 : i32
    %41 = vector.broadcast %c0_i32_21 : i32 to vector<8x16xi32>
    %42 = arith.cmpi slt, %38, %41 : vector<8x16xi32>
    %c0_i32_22 = arith.constant 0 : i32
    %43 = arith.cmpi slt, %36, %c0_i32_22 : i32
    %44 = vector.broadcast %43 : i1 to vector<8x16xi1>
    %45 = vector.broadcast %44 : vector<8x16xi1> to vector<8x16xi1>
    %46 = arith.xori %42, %45 : vector<8x16xi1>
    %47 = arith.andi %46, %40 : vector<8x16xi1>
    %48 = vector.broadcast %36 : i32 to vector<8x16xi32>
    %49 = arith.addi %38, %48 : vector<8x16xi32>
    %50 = arith.select %47, %49, %38 : vector<8x16xi1>, vector<8x16xi32>
    %c4_i32 = arith.constant 4 : i32
    %51 = vector.broadcast %c4_i32 : i32 to vector<8x16xi32>
    %52 = arith.cmpi sge, %50, %51 : vector<8x16xi32>
    %53 = arith.select %52, %33, %30 : vector<8x16xi1>, vector<8x16xf32>
    %54 = vector.extract_strided_slice %30 {offsets = [0, 0], sizes = [8, 4], strides = [1, 1]} : vector<8x16xf32> to vector<8x4xf32>
    %55 = vector.extract_strided_slice %30 {offsets = [0, 4], sizes = [8, 4], strides = [1, 1]} : vector<8x16xf32> to vector<8x4xf32>
    %56 = vector.extract_strided_slice %30 {offsets = [0, 8], sizes = [8, 4], strides = [1, 1]} : vector<8x16xf32> to vector<8x4xf32>
    %57 = vector.extract_strided_slice %30 {offsets = [0, 12], sizes = [8, 4], strides = [1, 1]} : vector<8x16xf32> to vector<8x4xf32>
    %58 = vector.extract_strided_slice %33 {offsets = [0, 4], sizes = [8, 4], strides = [1, 1]} : vector<8x16xf32> to vector<8x4xf32>
    %59 = vector.extract_strided_slice %33 {offsets = [0, 12], sizes = [8, 4], strides = [1, 1]} : vector<8x16xf32> to vector<8x4xf32>
    %60 = arith.mulf %58, %2 : vector<8x4xf32>
    %61 = arith.addf %54, %60 : vector<8x4xf32>
    %cst_23 = arith.constant 0.000000e+00 : f32
    %62 = vector.broadcast %cst_23 : f32 to vector<8x4xf32>
    %63 = tpu.concatenate %61, %62 in 1 : vector<8x4xf32>, vector<8x4xf32> -> vector<8x8xf32>
    %c120 = arith.constant 120 : index
    %c0_24 = arith.constant 0 : index
    %64 = vector.load %arg3[%c120, %c0_24] : memref<176x128xf32, #tpu.memory_space<vmem>>, vector<8x16xf32>
    %cst_25 = arith.constant dense<0.000000e+00> : vector<8x16xf32>
    %65 = tpu.matmul %63, %64, %cst_25 {dimension_numbers = #tpu.dot_dimension_numbers<[1], [0], [0], [1], [0, 0, 1, 1], [], []>} : vector<8x8xf32>, vector<8x16xf32>, vector<8x16xf32> -> vector<8x16xf32>
    %c3 = arith.constant 3 : index
    %c0_26 = arith.constant 0 : index
    %66 = vector.load %arg4[%c3, %c0_26] : memref<8x128xf32, #tpu.memory_space<vmem>>, vector<1x16xf32>
    %67 = vector.broadcast %66 : vector<1x16xf32> to vector<8x16xf32>
    %68 = arith.addf %65, %67 : vector<8x16xf32>
    %cst_27 = arith.constant 0.000000e+00 : f32
    %69 = vector.broadcast %cst_27 : f32 to vector<8x16xf32>
    %70 = arith.subf %69, %68 : vector<8x16xf32>
    %71 = math.exp %70 : vector<8x16xf32>
    %cst_28 = arith.constant 1.000000e+00 : f32
    %72 = vector.broadcast %cst_28 : f32 to vector<8x16xf32>
    %73 = arith.addf %72, %71 : vector<8x16xf32>
    %74 = arith.divf %68, %73 : vector<8x16xf32>
    %c128 = arith.constant 128 : index
    %c0_29 = arith.constant 0 : index
    %75 = vector.load %arg3[%c128, %c0_29] : memref<176x128xf32, #tpu.memory_space<vmem>>, vector<16x32xf32>
    %cst_30 = arith.constant dense<0.000000e+00> : vector<8x32xf32>
    %76 = tpu.matmul %74, %75, %cst_30 {dimension_numbers = #tpu.dot_dimension_numbers<[1], [0], [0], [1], [0, 0, 1, 1], [], []>} : vector<8x16xf32>, vector<16x32xf32>, vector<8x32xf32> -> vector<8x32xf32>
    %c4 = arith.constant 4 : index
    %c0_31 = arith.constant 0 : index
    %77 = vector.load %arg4[%c4, %c0_31] : memref<8x128xf32, #tpu.memory_space<vmem>>, vector<1x32xf32>
    %78 = vector.broadcast %77 : vector<1x32xf32> to vector<8x32xf32>
    %79 = arith.addf %76, %78 : vector<8x32xf32>
    %cst_32 = arith.constant 0.000000e+00 : f32
    %80 = vector.broadcast %cst_32 : f32 to vector<8x32xf32>
    %81 = arith.subf %80, %79 : vector<8x32xf32>
    %82 = math.exp %81 : vector<8x32xf32>
    %cst_33 = arith.constant 1.000000e+00 : f32
    %83 = vector.broadcast %cst_33 : f32 to vector<8x32xf32>
    %84 = arith.addf %83, %82 : vector<8x32xf32>
    %85 = arith.divf %79, %84 : vector<8x32xf32>
    %c144 = arith.constant 144 : index
    %c0_34 = arith.constant 0 : index
    %86 = vector.load %arg3[%c144, %c0_34] : memref<176x128xf32, #tpu.memory_space<vmem>>, vector<32x16xf32>
    %cst_35 = arith.constant dense<0.000000e+00> : vector<8x16xf32>
    %87 = tpu.matmul %85, %86, %cst_35 {dimension_numbers = #tpu.dot_dimension_numbers<[1], [0], [0], [1], [0, 0, 1, 1], [], []>} : vector<8x32xf32>, vector<32x16xf32>, vector<8x16xf32> -> vector<8x16xf32>
    %c5 = arith.constant 5 : index
    %c0_36 = arith.constant 0 : index
    %88 = vector.load %arg4[%c5, %c0_36] : memref<8x128xf32, #tpu.memory_space<vmem>>, vector<1x16xf32>
    %89 = vector.broadcast %88 : vector<1x16xf32> to vector<8x16xf32>
    %90 = arith.addf %87, %89 : vector<8x16xf32>
    %cst_37 = arith.constant 0.000000e+00 : f32
    %91 = vector.broadcast %cst_37 : f32 to vector<8x16xf32>
    %92 = arith.maximumf %90, %91 : vector<8x16xf32>
    %93 = math.absf %90 : vector<8x16xf32>
    %cst_38 = arith.constant 0.000000e+00 : f32
    %94 = vector.broadcast %cst_38 : f32 to vector<8x16xf32>
    %95 = arith.subf %94, %93 : vector<8x16xf32>
    %96 = math.exp %95 : vector<8x16xf32>
    %97 = math.log1p %96 : vector<8x16xf32>
    %98 = arith.addf %92, %97 : vector<8x16xf32>
    %99 = arith.subf %98, %0 : vector<8x16xf32>
    %cst_39 = arith.constant 1.000000e+00 : f32
    %100 = vector.broadcast %cst_39 : f32 to vector<8x4xf32>
    %101 = arith.divf %100, %59 : vector<8x4xf32>
    %102 = arith.mulf %58, %101 : vector<8x4xf32>
    %103 = arith.subf %54, %56 : vector<8x4xf32>
    %104 = arith.mulf %103, %101 : vector<8x4xf32>
    %105 = arith.mulf %102, %102 : vector<8x4xf32>
    %106 = arith.mulf %104, %104 : vector<8x4xf32>
    %107 = arith.addf %105, %106 : vector<8x4xf32>
    %cst_40 = arith.constant 1.000000e+00 : f32
    %108 = vector.broadcast %cst_40 : f32 to vector<8x4xf32>
    %109 = arith.subf %107, %108 : vector<8x4xf32>
    %110 = arith.subf %55, %57 : vector<8x4xf32>
    %cst_41 = arith.constant 2.000000e+00 : f32
    %111 = vector.broadcast %cst_41 : f32 to vector<8x4xf32>
    %112 = arith.mulf %111, %110 : vector<8x4xf32>
    %113 = arith.subf %109, %112 : vector<8x4xf32>
    %cst_42 = arith.constant 5.000000e-01 : f32
    %114 = vector.broadcast %cst_42 : f32 to vector<8x4xf32>
    %115 = arith.mulf %114, %113 : vector<8x4xf32>
    %116 = arith.mulf %99, %99 : vector<8x16xf32>
    %cst_43 = arith.constant 7.812500e-03 : f32
    %117 = vector.broadcast %cst_43 : f32 to vector<8x16xf32>
    %118 = arith.mulf %116, %117 : vector<8x16xf32>
    %119 = tpu.concatenate %118, %115 in 1 : vector<8x16xf32>, vector<8x4xf32> -> vector<8x20xf32>
    %cst_44 = arith.constant dense<0.000000e+00> : vector<20xf32>
    %120 = vector.multi_reduction <add>, %119, %cst_44 [0] : vector<8x20xf32> to vector<20xf32>
    %121 = vector.shape_cast %120 : vector<20xf32> to vector<1x20xf32>
    %122 = vector.extract_strided_slice %121 {offsets = [0, 0], sizes = [1, 16], strides = [1, 1]} : vector<1x20xf32> to vector<1x16xf32>
    %cst_45 = arith.constant dense<0.000000e+00> : vector<1xf32>
    %123 = vector.multi_reduction <add>, %122, %cst_45 [1] : vector<1x16xf32> to vector<1xf32>
    %124 = vector.shape_cast %123 : vector<1xf32> to vector<1x1xf32>
    %125 = vector.extract_strided_slice %121 {offsets = [0, 16], sizes = [1, 4], strides = [1, 1]} : vector<1x20xf32> to vector<1x4xf32>
    %cst_46 = arith.constant dense<0.000000e+00> : vector<1xf32>
    %126 = vector.multi_reduction <add>, %125, %cst_46 [1] : vector<1x4xf32> to vector<1xf32>
    %127 = vector.shape_cast %126 : vector<1xf32> to vector<1x1xf32>
    %128 = tpu.iota {dimensions = array<i32: 1>} : vector<8x96xi32>
    %129 = tpu.iota {dimensions = array<i32: 0>} : vector<8x96xi32>
    %c0_i32_47 = arith.constant 0 : i32
    %130 = vector.broadcast %c0_i32_47 : i32 to vector<8x96xi32>
    %131 = arith.cmpi eq, %129, %130 : vector<8x96xi32>
    %c0_i32_48 = arith.constant 0 : i32
    %132 = vector.broadcast %c0_i32_48 : i32 to vector<8x96xi32>
    %133 = arith.cmpi eq, %128, %132 : vector<8x96xi32>
    %134 = arith.andi %131, %133 : vector<8x96xi1>
    %c0_i32_49 = arith.constant 0 : i32
    %135 = vector.broadcast %c0_i32_49 : i32 to vector<8x96xi32>
    %136 = arith.cmpi eq, %129, %135 : vector<8x96xi32>
    %c1_i32_50 = arith.constant 1 : i32
    %137 = vector.broadcast %c1_i32_50 : i32 to vector<8x96xi32>
    %138 = arith.cmpi eq, %128, %137 : vector<8x96xi32>
    %139 = arith.andi %136, %138 : vector<8x96xi1>
    %cst_51 = arith.constant 0.000000e+00 : f32
    %140 = vector.shape_cast %127 : vector<1x1xf32> to vector<1x1xf32>
    %141 = vector.broadcast %140 : vector<1x1xf32> to vector<8x96xf32>
    %142 = vector.broadcast %cst_51 : f32 to vector<8x96xf32>
    %143 = arith.select %139, %141, %142 : vector<8x96xi1>, vector<8x96xf32>
    %144 = vector.shape_cast %124 : vector<1x1xf32> to vector<1x1xf32>
    %145 = vector.broadcast %144 : vector<1x1xf32> to vector<8x96xf32>
    %146 = arith.select %134, %145, %143 : vector<8x96xi1>, vector<8x96xf32>
    %147 = tpu.concatenate %53, %98, %146 in 1 : vector<8x16xf32>, vector<8x16xf32>, vector<8x96xf32> -> vector<8x128xf32>
    %c0_52 = arith.constant 0 : index
    %c0_53 = arith.constant 0 : index
    %148 = vector.load %arg5[%c0_52, %c0_53] : memref<8x128xf32, #tpu.memory_space<vmem>>, vector<8x128xf32>
    tpu.vector_store %arg5[%c0_52, %c0_53], %147 {strides = array<i32>} : memref<8x128xf32, #tpu.memory_space<vmem>>, vector<8x128xf32>,
    return
  }
}

</mosaic_0001>

<bundles_post_ra>
// kernel: cvae_forward.1
= control target key start
LH: loop header
LB: loop body
LE: loop exit
PB: predicated region body
PF: predicated region fallthrough
CT: control target
= control target key end

     0   :  { %10 = vsyncpa [#allocation3], 0  ;;  %s684_s0 = inlined_call_operand.vmem [shape: f32[8,16], index: 0, kind: input, shape index: {}]   ;;  %s685_s1 = inlined_call_operand.hbm [shape: f32[8,8], index: 1, kind: input, shape index: {}]   ;;  %s686_s2 = inlined_call_operand.vmem [shape: f32[8,4], index: 2, kind: input, shape index: {}]   ;;  %s687_s3 = inlined_call_operand.hbm [shape: f32[176,128], index: 3, kind: input, shape index: {}]   ;;  %s688_s4 = inlined_call_operand.hbm [shape: f32[8,128], index: 4, kind: input, shape index: {}]   ;;  %s689_s5 = inlined_call_operand.vmem [shape: f32[8,128], index: 5, kind: output, shape index: {}]  }
   0x1   :  { %11 = vsyncpa [#allocation5], 0  ;;  %s31_s20 = sshll.u32 %s687_s3, 4  ;;  %s588_s21 = smov [#allocation4]   ;;  %s32_s20 = int_to_ptr.hbm [resolvable:$true] %s31_s20 }
   0x2   :  { %s33_s22 = sshll.u32 %s588_s21, 4  ;;  %s19_s25 = sshll.u32 %s685_s1, 4  ;;  %s34_s22 = int_to_ptr.vmem [resolvable:$true] %s33_s22  ;;  %s20_s25 = int_to_ptr.hbm [resolvable:$true] %s19_s25 }
   0x3   :  { %s589_s26 = smov 128   ;;  %s590_s27 = smov 8  }
   0x4   :  { %39 = dma.hbm_to_vmem [thread:$0]  %s32_s20, 2816, %s34_s22, [#allocation5], %s589_s26, %s589_s26, %s590_s27  }
   0x5   :  { %s591_s28 = smov [#allocation2]   ;;  %s45_s7 = sshll.u32 %s688_s4, 4  ;;  %s46_s7 = int_to_ptr.hbm [resolvable:$true] %s45_s7 }
   0x6   :  { %s21_s29 = sshll.u32 %s591_s28, 4  ;;  %s592_s3 = smov [#allocation6]   ;;  %s22_s29 = int_to_ptr.vmem [resolvable:$true] %s21_s29 }
   0x7   :  { %24 = dma.hbm_to_vmem [thread:$0]  %s20_s25, 128, %s22_s29, [#allocation3]  }
   0x8   :  { %s47_s8 = sshll.u32 %s592_s3, 4  ;;  %s48_s8 = int_to_ptr.vmem [resolvable:$true] %s47_s8 }
   0x9   :  { %50 = dma.hbm_to_vmem [thread:$0]  %s46_s7, 128, %s48_s8, [#allocation5]  }
   0xa   :  { %584 = dma.done.wait [#allocation3], 128  }
   0xb   :  { %585 = vsyncadd [#allocation3], 4294967168 }
   0xc   :  { %586 = dma.done.wait [#allocation5], 2944  }
   0xd   :  { %587 = vsyncadd [#allocation5], 4294964352  ;;  %v64_v0 = vld [vmem:[#allocation2] sm:$0xff]  ;;  %v74_v1 = vld [vmem:[#allocation4 + $0x10] sm:$0xff]  ;;  %s593_s1 = smov 16   ;;  %vm70_vm0 = vcmask 130048  }
   0xe   :  { %v73_v2 = vld [vmem:[#allocation4 + $0x8] sm:$0xff]  ;;  %67 = vrot.lane.b32.xlu0 %v64_v0, %s593_s1  ;;  %94 = vmatpush.msra.mxu0 %v74_v1  ;;  %v72_v3 = vld [vmem:[#allocation4] sm:$0xff]  ;;  %v644_v4 = vld [vmem:[%s684_s0] sm:$0xff]  ;;  %vm77_vm1 = vcmask 195584   ;;  %vm130_vm6 = vcmask 523264   ;;  %s594_s11 = smov 4  }
   0xf   :  { %v127_v7 = vld [vmem:[#allocation4 + $0x50] sm:$0xff]  ;;  %v126_v8 = vld [vmem:[#allocation4 + $0x48] sm:$0xff]  ;;  %v125_v9 = vld [vmem:[#allocation4 + $0x40] sm:$0xff]  ;;  %vm179_vm11 = vcmask 261120   ;;  %s596_s12 = smov 120   ;;  %s597_s13 = smov 116  }
  0x10   :  { %95 = vmatpush.msra.mxu0 %v73_v2  ;;  %142 = vmatpush.msra.mxu1 %v127_v7  ;;  %v124_v10 = vld [vmem:[#allocation4 + $0x38] sm:$0xff]  ;;  %v123_v11 = vld [vmem:[#allocation4 + $0x30] sm:$0xff]  ;;  %v122_v13 = vld [vmem:[#allocation4 + $0x28] sm:$0xff]  ;;  %s598_s14 = smov 12   ;;  %s599_s15 = smov 112  }
  0x11   :  { %v482_v12 = vld [vmem:[#allocation6] ss:$0 sm:$0xff]  ;;  %v121_v14 = vld [vmem:[#allocation4 + $0x20] sm:$0xff]  ;;  %v120_v17 = vld [vmem:[#allocation4 + $0x18] sm:$0xff]  ;;  %s600_s16 = smov 32  }
  0x12   :  { %96 = vmatpush.msra.mxu0 %v72_v3  ;;  %143 = vmatpush.msra.mxu1 %v126_v8  ;;  %v176_v33 = vld [vmem:[#allocation4 + $0x70] sm:$0xff]  ;;  %v175_v35 = vld [vmem:[#allocation4 + $0x68] sm:$0xff]  ;;  %v174_v36 = vld [vmem:[#allocation4 + $0x60] sm:$0xff] }
  0x13   :  { %195 = vmatpush.msra.mxu2 %v176_v33  ;;  %v483_v34 = vld [vmem:[#allocation6 + $0x1] ss:$0 sm:$0xff]  ;;  %v173_v39 = vld [vmem:[#allocation4 + $0x58] sm:$0xff]  ;;  %v484_v56 = vld [vmem:[#allocation6 + $0x2] ss:$0 sm:$0xff] }
  0x14   :  { %144 = vmatpush.msra.mxu1 %v125_v9  ;;  %v65_v41 = vld [vmem:[%s686_s2] sm:$0xff]  ;;  %s595_s2 = smov 124   ;;  %v280_v33 = vld [vmem:[#allocation4 + $0x80] sm:$0xff] }
  0x15   :  { %196 = vmatpush.msra.mxu2 %v175_v35 }
  0x16   :  { %145 = vmatpush.msra.mxu1 %v124_v10  ;;  %223 = vrot.lane.b32.xlu0 %v65_v41, %s594_s11 }
  0x17   :  { %197 = vmatpush.msra.mxu2 %v174_v36 }
  0x18   :  { %146 = vmatpush.msra.mxu1 %v123_v11  ;;  %v234_v11 = vld [vmem:[#allocation4 + $0x78] sm:$0xff] }
  0x19   :  { %198 = vmatpush.msra.mxu2 %v173_v39  ;;  %256 = vmatpush.msra.mxu3 %v234_v11 }
  0x1a   :  { %147 = vmatpush.msra.mxu1 %v122_v13 }
  0x1c   :  { %148 = vmatpush.msra.mxu1 %v121_v14 }
  0x1e   :  { %149 = vmatpush.msra.mxu1 %v120_v17 }
  0x80   :  { %v68_v5 = vpop.permute.xlu0 %67 }
  0x81   :  { %v71_v6 = vsel %vm70_vm0, %v644_v4, %v68_v5 }
  0x82   :  { %462 = vmatmul.msk.f32.vlgmr.msra.gmra.mxu0 %vm77_vm1, %v71_v6  ;;  %vm232_vm1 = vcmask 31744  }
  0x88   :  { %v224_v61 = vpop.permute.xlu0 %223 }
  0xff   :  { %v98_v15 = vpop.f32.mrf.mxu0 }
 0x100   :  { %v99_v16 = vadd.f32 %v482_v12, %v98_v15 }
 0x102   :  { %v101_v18 = vsub.f32 0.0, %v99_v16 }
 0x104   :  { %v102_v19 = vmul.f32 1.442695, %v101_v18 }
 0x106   :  { %488 = vpow2.f32 %v102_v19 }
 0x10c   :  { %v489_v20 = vpop.eup %488 }
 0x10d   :  { %v104_v21 = vadd.f32 1.0, %v489_v20 }
 0x10f   :  { %490 = vrcp.f32 %v104_v21  ;;  %v116_v25 = vand.u32 2147483648, %v104_v21  ;;  %v114_v27 = vand.u32 2147483647, %v104_v21  ;;  %vm110_vm3 = vweird.f32 %v104_v21 }
 0x111   :  { %v117_v29 = vor.u32 1.1754944e-38, %v116_v25  ;;  %vm115_vm5 = vcmp.eq.f32.partialorder %v114_v27, 8.507059e+37  ;;  %v485_v27 = vld [vmem:[#allocation6 + $0x3] ss:$0 sm:$0xff] }
 0x115   :  { %v491_v22 = vpop.eup %490 }
 0x116   :  { %v106_v23 = vmul.f32 %v491_v22, %v104_v21  ;;  %vm111_vm2 = vweird.f32 %v491_v22 }
 0x117   :  { %vm112_vm4 = vmor %vm110_vm3, %vm111_vm2  ;;  %vm237_vm2 = vcmask 64512  }
 0x118   :  { %v107_v24 = vsub.f32 1.0, %v106_v23 }
 0x11a   :  { %v108_v26 = vmul.f32 %v491_v22, %v107_v24 }
 0x11c   :  { %v109_v28 = vadd.f32 %v491_v22, %v108_v26 }
 0x11e   :  { %v113_v30 = vsel %vm112_vm4, %v491_v22, %v109_v28 }
 0x11f   :  { %v118_v31 = vsel %vm115_vm5, %v117_v29, %v113_v30  ;;  %v281_v30 = vld [vmem:[#allocation4 + $0x88] sm:$0xff] }
 0x120   :  { %v119_v32 = vmul.f32 %v118_v31, %v99_v16  ;;  %301 = vmatpush.msrb.mxu3 %v281_v30 }
 0x122   :  { %463 = vmatmul.msk.f32.vlgmr.msra.gmra.mxu1 %vm130_vm6, %v119_v32  ;;  %302 = vmatpush.msrb.mxu3 %v280_v33 }
 0x19f   :  { %v151_v37 = vpop.f32.mrf.mxu1 }
 0x1a0   :  { %v152_v38 = vadd.f32 %v483_v34, %v151_v37 }
 0x1a2   :  { %v154_v40 = vsub.f32 0.0, %v152_v38 }
 0x1a4   :  { %v155_v42 = vmul.f32 1.442695, %v154_v40 }
 0x1a6   :  { %492 = vpow2.f32 %v155_v42 }
 0x1ac   :  { %v493_v43 = vpop.eup %492 }
 0x1ad   :  { %v157_v44 = vadd.f32 1.0, %v493_v43 }
 0x1af   :  { %494 = vrcp.f32 %v157_v44  ;;  %v169_v48 = vand.u32 2147483648, %v157_v44  ;;  %v167_v50 = vand.u32 2147483647, %v157_v44  ;;  %vm163_vm8 = vweird.f32 %v157_v44 }
 0x1b1   :  { %v170_v52 = vor.u32 1.1754944e-38, %v169_v48  ;;  %vm168_vm10 = vcmp.eq.f32.partialorder %v167_v50, 8.507059e+37  ;;  %v486_v50 = vld [vmem:[#allocation6 + $0x4] ss:$0 sm:$0xff] }
 0x1b5   :  { %v495_v45 = vpop.eup %494 }
 0x1b6   :  { %v159_v46 = vmul.f32 %v495_v45, %v157_v44  ;;  %vm164_vm7 = vweird.f32 %v495_v45 }
 0x1b7   :  { %vm165_vm9 = vmor %vm163_vm8, %vm164_vm7 }
 0x1b8   :  { %v160_v47 = vsub.f32 1.0, %v159_v46 }
 0x1ba   :  { %v161_v49 = vmul.f32 %v495_v45, %v160_v47 }
 0x1bc   :  { %v162_v51 = vadd.f32 %v495_v45, %v161_v49  ;;  %v329_v49 = vld [vmem:[#allocation4 + $0xa8] sm:$0xff] }
 0x1bd   :  { %347 = vmatpush.msrb.mxu0 %v329_v49 }
 0x1be   :  { %v166_v53 = vsel %vm165_vm9, %v495_v45, %v162_v51  ;;  %v328_v51 = vld [vmem:[#allocation4 + $0xa0] sm:$0xff] }
 0x1bf   :  { %v171_v54 = vsel %vm168_vm10, %v170_v52, %v166_v53  ;;  %348 = vmatpush.msrb.mxu0 %v328_v51  ;;  %v327_v53 = vld [vmem:[#allocation4 + $0x98] sm:$0xff] }
 0x1c0   :  { %v172_v55 = vmul.f32 %v171_v54, %v152_v38 }
 0x1c1   :  { %349 = vmatpush.msrb.mxu0 %v327_v53 }
 0x1c2   :  { %464 = vmatmul.msk.f32.vlgmr.msra.gmra.mxu2 %vm179_vm11, %v172_v55  ;;  %v326_v55 = vld [vmem:[#allocation4 + $0x90] sm:$0xff] }
 0x1c3   :  { %350 = vmatpush.msrb.mxu0 %v326_v55 }
 0x245   :  { %v200_v57 = vpop.f32.mrf.mxu2 }
 0x246   :  { %v653_v58 = vadd.f32 %v484_v56, %v200_v57 }
 0x248   :  { %v203_v59 = vadd.f32 1e-08, %v653_v58 }
 0x24a   :  { %v204_v60 = vmul.f32 1.442695, %v203_v59 }
 0x24c   :  { %496 = vpow2.f32 %v204_v60 }
 0x252   :  { %v656_v62 = vpop.eup %496 }
 0x253   :  { %v226_v63 = vmul.f32 %v656_v62, %v224_v61  ;;  %498 = vrcp.f32 %v656_v62  ;;  %v382_v3 = vand.u32 2147483648, %v656_v62  ;;  %v380_v6 = vand.u32 2147483647, %v656_v62 }
 0x254   :  { %vm376_vm13 = vweird.f32 %v656_v62 }
 0x255   :  { %228 = vrot.lane.b32.xlu1 %v226_v63, %s595_s2  ;;  %v383_v8 = vor.u32 1.1754944e-38, %v382_v3  ;;  %vm381_vm15 = vcmp.eq.f32.partialorder %v380_v6, 8.507059e+37 }
 0x259   :  { %v499_v0 = vpop.eup %498 }
 0x25a   :  { %v372_v1 = vmul.f32 %v499_v0, %v656_v62  ;;  %vm377_vm12 = vweird.f32 %v499_v0 }
 0x25b   :  { %vm378_vm14 = vmor %vm376_vm13, %vm377_vm12  ;;  %vm418_vm13 = vcmask 162816  }
 0x25c   :  { %v373_v2 = vsub.f32 1.0, %v372_v1 }
 0x25d   :  { %392 = vrot.lane.b32.xlu1 %v653_v58, %s596_s12 }
 0x25e   :  { %v374_v5 = vmul.f32 %v499_v0, %v373_v2 }
 0x260   :  { %v375_v7 = vadd.f32 %v499_v0, %v374_v5 }
 0x262   :  { %v379_v9 = vsel %vm378_vm14, %v499_v0, %v375_v7 }
 0x263   :  { %v384_v10 = vsel %vm381_vm15, %v383_v8, %v379_v9 }
 0x264   :  { %396 = vrot.lane.b32.xlu2 %v384_v10, %s597_s13 }
 0x26c   :  { %387 = vrot.lane.b32.xlu2 %v384_v10, %s596_s12  ;;  %v487_v10 = vld [vmem:[#allocation6 + $0x5] ss:$0 sm:$0xff] }
 0x2be   :  { %v397_v17 = vpop.permute.xlu2 %396 }
 0x2c6   :  { %v388_v20 = vpop.permute.xlu2 %387 }
 0x2c7   :  { %v229_v12 = vpop.permute.xlu1 %228  ;;  %v390_v21 = vmul.f32 %v656_v62, %v388_v20 }
 0x2c8   :  { %v231_v13 = vadd.f32 %v229_v12, %v653_v58 }
 0x2c9   :  { %v400_v22 = vmul.f32 %v390_v21, %v390_v21 }
 0x2ca   :  { %v233_v14 = vsel %vm232_vm1, %v231_v13, 0.0 }
 0x2cb   :  { %465 = vmatmul.msk.f32.vlgmr.msra.gmra.mxu3 %vm237_vm2, %v233_v14 }
 0x2cf   :  { %v393_v15 = vpop.permute.xlu1 %392 }
 0x2d0   :  { %v395_v16 = vsub.f32 %v653_v58, %v393_v15 }
 0x2d2   :  { %v399_v18 = vmul.f32 %v397_v17, %v395_v16  ;;  %v408_v25 = vmul.f32 2.0, %v395_v16 }
 0x2d4   :  { %v401_v19 = vmul.f32 %v399_v18, %v399_v18 }
 0x2d6   :  { %403 = vrot.lane.b32.xlu0 %v401_v19, %s594_s11 }
 0x348   :  { %v404_v23 = vpop.permute.xlu0 %403 }
 0x349   :  { %v406_v24 = vadd.f32 %v404_v23, %v400_v22 }
 0x34b   :  { %v468_v26 = vadd.f32 -1.0, %v406_v24 }
 0x34d   :  { %v409_v28 = vsub.f32 %v468_v26, %v408_v25 }
 0x34e   :  { %v258_v29 = vpop.f32.mrf.mxu3 }
 0x34f   :  { %v410_v31 = vmul.f32 0.5, %v409_v28  ;;  %v259_v32 = vadd.f32 %v485_v27, %v258_v29 }
 0x351   :  { %v261_v34 = vsub.f32 0.0, %v259_v32  ;;  %414 = vrot.lane.b32.xlu1 %v410_v31, %s598_s14 }
 0x353   :  { %v262_v35 = vmul.f32 1.442695, %v261_v34 }
 0x355   :  { %500 = vpow2.f32 %v262_v35 }
 0x35b   :  { %v501_v36 = vpop.eup %500 }
 0x35c   :  { %v264_v37 = vadd.f32 1.0, %v501_v36 }
 0x35e   :  { %502 = vrcp.f32 %v264_v37  ;;  %v276_v41 = vand.u32 2147483648, %v264_v37  ;;  %v274_v43 = vand.u32 2147483647, %v264_v37  ;;  %vm270_vm4 = vweird.f32 %v264_v37 }
 0x360   :  { %v277_v45 = vor.u32 1.1754944e-38, %v276_v41  ;;  %vm275_vm6 = vcmp.eq.f32.partialorder %v274_v43, 8.507059e+37  ;;  %v206_v41 = vlaneseq }
 0x362   :  { %v207_v43 = vand.u32 127, %v206_v41 }
 0x364   :  { %v503_v38 = vpop.eup %502  ;;  %vm441_vm15 = vcmp.eq.s32.totalorder %v207_v43, 1  ;;  %vm439_vm2 = vcmp.eq.s32.totalorder %v207_v43, 0 }
 0x365   :  { %v266_v39 = vmul.f32 %v503_v38, %v264_v37  ;;  %vm271_vm3 = vweird.f32 %v503_v38 }
 0x366   :  { %vm272_vm5 = vmor %vm270_vm4, %vm271_vm3 }
 0x367   :  { %v267_v40 = vsub.f32 1.0, %v266_v39 }
 0x369   :  { %v268_v42 = vmul.f32 %v503_v38, %v267_v40 }
 0x36b   :  { %v269_v44 = vadd.f32 %v503_v38, %v268_v42  ;;  %v437_v42 = vshrl.u32 %v206_v41, 7 }
 0x36d   :  { %v273_v46 = vsel %vm272_vm5, %v503_v38, %v269_v44  ;;  %vm438_vm14 = vcmp.eq.s32.totalorder %v437_v42, 0 }
 0x36e   :  { %v278_v47 = vsel %vm275_vm6, %v277_v45, %v273_v46  ;;  %vm442_vm3 = vmand %vm438_vm14, %vm441_vm15 }
 0x36f   :  { %v279_v48 = vmul.f32 %v278_v47, %v259_v32  ;;  %vm440_vm4 = vmand %vm438_vm14, %vm439_vm2 }
 0x371   :  { %466 = vmatmul.msk.f32.vlgmr.msrb.gmra.mxu3 %vm70_vm0, %v279_v48  ;;  %v212_v48 = vand.u32 7, %v207_v43 }
 0x373   :  { %vm220_vm5 = vcmp.ge.s32.totalorder %v212_v48, 4 }
 0x3c3   :  { %v415_v30 = vpop.permute.xlu1 %414 }
 0x3f4   :  { %v304_v52 = vpop.f32.mrf.mxu3 }
 0x3f5   :  { %v305_v54 = vadd.f32 %v486_v50, %v304_v52  ;;  %v221_v50 = vsel %vm220_vm5, %v656_v62, %v653_v58 }
 0x3f7   :  { %v307_v56 = vsub.f32 0.0, %v305_v54 }
 0x3f9   :  { %v308_v57 = vmul.f32 1.442695, %v307_v56 }
 0x3fb   :  { %504 = vpow2.f32 %v308_v57 }
 0x401   :  { %v505_v59 = vpop.eup %504 }
 0x402   :  { %v310_v60 = vadd.f32 1.0, %v505_v59 }
 0x404   :  { %506 = vrcp.f32 %v310_v60  ;;  %v322_v1 = vand.u32 2147483648, %v310_v60  ;;  %v320_v3 = vand.u32 2147483647, %v310_v60  ;;  %vm316_vm8 = vweird.f32 %v310_v60 }
 0x406   :  { %v323_v6 = vor.u32 1.1754944e-38, %v322_v1  ;;  %vm321_vm10 = vcmp.eq.f32.partialorder %v320_v3, 8.507059e+37 }
 0x40a   :  { %v507_v61 = vpop.eup %506 }
 0x40b   :  { %v312_v63 = vmul.f32 %v507_v61, %v310_v60  ;;  %vm317_vm7 = vweird.f32 %v507_v61 }
 0x40c   :  { %vm318_vm9 = vmor %vm316_vm8, %vm317_vm7 }
 0x40d   :  { %v313_v0 = vsub.f32 1.0, %v312_v63 }
 0x40f   :  { %v314_v2 = vmul.f32 %v507_v61, %v313_v0 }
 0x411   :  { %v315_v5 = vadd.f32 %v507_v61, %v314_v2 }
 0x413   :  { %v319_v7 = vsel %vm318_vm9, %v507_v61, %v315_v5 }
 0x414   :  { %v324_v8 = vsel %vm321_vm10, %v323_v6, %v319_v7 }
 0x415   :  { %v325_v9 = vmul.f32 %v324_v8, %v305_v54 }
 0x417   :  { %467 = vmatmul.msk.f32.vlgmr.msrb.gmra.mxu0 %vm179_vm11, %v325_v9 }
 0x494   :  { %v352_v11 = vpop.f32.mrf.mxu0 }
 0x495   :  { %v353_v12 = vadd.f32 %v487_v10, %v352_v11 }
 0x497   :  { %v356_v13 = vand.u32 2147483647, %v353_v12  ;;  %v355_v24 = vmax.f32 %v353_v12, 0.0 }
 0x499   :  { %v357_v14 = vsub.f32 0.0, %v356_v13 }
 0x49b   :  { %v358_v15 = vmul.f32 1.442695, %v357_v14 }
 0x49d   :  { %508 = vpow2.f32 %v358_v15 }
 0x4a3   :  { %v509_v16 = vpop.eup %508 }
 0x4a4   :  { %v360_v17 = vadd.f32 1.0, %v509_v16  ;;  %v363_v18 = vmul.f32 -0.5, %v509_v16  ;;  %v366_v20 = vand.u32 2147483647, %v509_v16 }
 0x4a6   :  { %510 = vlog2.f32 %v360_v17  ;;  %v364_v19 = vadd.f32 1.0, %v363_v18  ;;  %vm367_vm12 = vcmp.lt.f32.partialorder %v366_v20, 0.0004427343 }
 0x4a8   :  { %v365_v23 = vmul.f32 %v509_v16, %v364_v19 }
 0x4ac   :  { %v511_v21 = vpop.eup %510 }
 0x4ad   :  { %v362_v22 = vmul.f32 0.6931472, %v511_v21 }
 0x4af   :  { %v368_v25 = vsel %vm367_vm12, %v365_v23, %v362_v22 }
 0x4b0   :  { %v369_v26 = vadd.f32 %v368_v25, %v355_v24 }
 0x4b2   :  { %v370_v27 = vsub.f32 %v369_v26, %v644_v4 }
 0x4b4   :  { %v411_v28 = vmul.f32 %v370_v27, %v370_v27 }
 0x4b6   :  { %v412_v29 = vmul.f32 0.0078125, %v411_v28 }
 0x4b8   :  { %v417_v31 = vsel %vm70_vm0, %v412_v29, %v415_v30 }
 0x4b9   :  { %v419_v32 = vsel %vm418_vm13, %v417_v31, 0.0 }
 0x4ba   :  { %v420_v33 = vrot.slane %v419_v32, 4 }
 0x4bc   :  { %v421_v34 = vadd.f32 %v420_v33, %v419_v32 }
 0x4be   :  { %v422_v35 = vrot.slane %v421_v34, 2 }
 0x4c0   :  { %v423_v36 = vadd.f32 %v422_v35, %v421_v34 }
 0x4c2   :  { %v424_v37 = vrot.slane %v423_v36, 1 }
 0x4c4   :  { %v425_v38 = vadd.f32 %v424_v37, %v423_v36 }
 0x4c6   :  { %430 = vrot.lane.b32.xlu2 %v425_v38, %s599_s15  ;;  %v426_v39 = vsel %vm70_vm0, %v425_v38, 0.0 }
 0x4c7   :  { %427 = vadd.xlane.f32.xlu1 %v426_v39 }
 0x4ce   :  { %446 = vrot.lane.b32.xlu2 %v369_v26, %s593_s1 }
 0x520   :  { %v431_v4 = vpop.permute.xlu2 %430 }
 0x521   :  { %v433_v40 = vsel %vm232_vm1, %v431_v4, 0.0 }
 0x522   :  { %434 = vadd.xlane.f32.xlu0 %v433_v40 }
 0x528   :  { %v447_v49 = vpop.permute.xlu2 %446 }
 0x529   :  { %v453_v51 = vsel %vm70_vm0, %v221_v50, %v447_v49 }
 0x53a   :  { %v428_v45 = vpop.xlane.xlu1 %427 }
 0x595   :  { %v435_v44 = vpop.xlane.xlu0 %434 }
 0x596   :  { %v443_v46 = vsel %vm442_vm3, %v435_v44, 0.0 }
 0x597   :  { %v444_v47 = vsel %vm440_vm4, %v428_v45, %v443_v46 }
 0x598   :  { %450 = vrot.lane.b32.xlu2 %v444_v47, %s600_s16 }
 0x5f2   :  { %v451_v52 = vpop.permute.xlu2 %450 }
 0x5f3   :  { %v454_v53 = vsel %vm179_vm11, %v453_v51, %v451_v52 }
 0x5f4   :  { %455 = vst [vmem:[%s689_s5] sm:$0xff] %v454_v53 }
 0x5f5   :  { %460 = vsyncpa [#allocation3], 1 }
 0x5f6   :  { %461 = vsyncpa [#allocation5], 1 }

</bundles_post_ra>
